<compile_context>
chip_gen: v7x
topology: tpu7x:2x2x1
jax: 0.10.0
libtpu: 0.0.40
codegen_flags: <defaults>
</compile_context>

<pallas_src>
import jax
import jax.numpy as jnp
from jax.experimental import pallas as pl
from jax.experimental.pallas import tpu as pltpu


def _round_up(n, m):
    return ((n + m - 1) // m) * m


# -----------------------------------------------------------------------------
# Kernel 1: encoder stand-in — tiled patchified matmul + bias + ReLU
# -----------------------------------------------------------------------------
def _encoder_matmul_kernel(x_ref, w_ref, b_ref, o_ref):
    acc = jnp.dot(x_ref[...], w_ref[...], preferred_element_type=jnp.float32)
    o_ref[...] = jnp.maximum(acc + b_ref[...], 0.0).astype(o_ref.dtype)


def encoder_stub(x, w_bf16, b_f32, patch=32):
    """x: (B, Cin, H, W) NCHW -> bf16 features (B, H/patch, W/patch, C)."""
    B, Cin, H, W = x.shape
    Hp, Wp = H // patch, W // patch
    K, C = w_bf16.shape

    # Patchify glue done in bf16 so the HBM round-trip is half-width.
    # TODO(synk): fold the patch gather into the encoder BlockSpec index_map
    # to avoid materializing the patchified tensor in HBM at all.
    p = x.astype(jnp.bfloat16).reshape(B, Cin, Hp, patch, Wp, patch)
    p = jnp.transpose(p, (0, 2, 4, 1, 3, 5)).reshape(B * Hp * Wp, K)

    M = B * Hp * Wp
    tm = 256 if M >= 256 else _round_up(M, 8)   # big M-tiles when available
    M_pad = _round_up(M, tm)
    if M_pad != M:
        p = jnp.pad(p, ((0, M_pad - M), (0, 0)))

    out = pl.pallas_call(
        _encoder_matmul_kernel,
        out_shape=jax.ShapeDtypeStruct((M_pad, C), jnp.bfloat16),
        grid=(M_pad // tm,),
        in_specs=[
            pl.BlockSpec((tm, K), lambda i: (i, 0)),   # activations, pipelined
            pl.BlockSpec((K, C), lambda i: (0, 0)),    # weight resident
            pl.BlockSpec((1, C), lambda i: (0, 0)),    # bias resident
        ],
        out_specs=pl.BlockSpec((tm, C), lambda i: (i, 0)),
        compiler_params=pltpu.CompilerParams(
            dimension_semantics=("parallel",)),
    )(p, w_bf16, b_f32.reshape(1, C))
    return out[:M].reshape(B, Hp, Wp, C)


# -----------------------------------------------------------------------------
# Kernel 2: freq-mean + (max_pool1d + avg_pool1d, k=3, s=1, p=1), 3-tap shifted
# -----------------------------------------------------------------------------
def _pool_kernel(feat_ref, o_ref):
    feat = feat_ref[0].astype(jnp.float32)          # (Hp, T, C)
    x = jnp.mean(feat, axis=0)                      # (T, C) == torch.mean(x, dim=2)
    T = x.shape[0]

    # Shifted neighbours via XLU roll along the time (sublane) axis.
    xp = pltpu.roll(x, shift=1, axis=0)             # xp[t] = x[t-1] (wraps at t=0)
    xn = pltpu.roll(x, shift=T - 1, axis=0)         # xn[t] = x[t+1] (wraps at t=T-1)

    row = jax.lax.broadcasted_iota(jnp.int32, (T, 1), 0)
    has_prev = row > 0
    has_next = row < (T - 1)

    # max_pool1d: -inf padding at the edges == clamp the missing tap to x itself.
    x1 = jnp.maximum(x, jnp.maximum(jnp.where(has_prev, xp, x),
                                    jnp.where(has_next, xn, x)))
    # avg_pool1d (count_include_pad=True): zero padding, always divide by 3.
    x2 = (jnp.where(has_prev, xp, 0.0) + x + jnp.where(has_next, xn, 0.0)) * (1.0 / 3.0)

    # dropout = identity (eval mode)
    o_ref[0] = (x1 + x2).astype(o_ref.dtype)


# -----------------------------------------------------------------------------
# Kernel 3: fc1 + ReLU + fc_audioset + sigmoid, lane-dense, M-tiled
# -----------------------------------------------------------------------------
def _fc_head_kernel(x_ref, w1_ref, b1_ref, w2_ref, b2_ref, logit_ref, prob_ref):
    h = jnp.dot(x_ref[...], w1_ref[...], preferred_element_type=jnp.float32)
    h = jnp.maximum(h + b1_ref[...], 0.0)           # F.relu_(fc1(x)); dropout = id
    logit = jnp.dot(h.astype(jnp.bfloat16), w2_ref[...],
                    preferred_element_type=jnp.float32) + b2_ref[...]
    logit_ref[...] = logit
    prob_ref[...] = jax.nn.sigmoid(logit)


def sed_head(feats, w1_bf16, b1_f32, w2p_bf16, b2p_f32, num_classes):
    """feats: (B, Hp, T, C) bf16.  Returns segment/clip logits & sigmoids."""
    B, Hp, T, C = feats.shape
    NCp = w2p_bf16.shape[1]                         # padded to multiple of 128

    # ---- pooling: one grid step per batch element (parallel / megacore) ----
    pooled = pl.pallas_call(
        _pool_kernel,
        out_shape=jax.ShapeDtypeStruct((B, T, C), jnp.bfloat16),
        grid=(B,),
        in_specs=[pl.BlockSpec((1, Hp, T, C), lambda b: (b, 0, 0, 0))],
        out_specs=pl.BlockSpec((1, T, C), lambda b: (b, 0, 0)),
        compiler_params=pltpu.CompilerParams(
            dimension_semantics=("parallel",)),
    )(feats)

    # ---- fc layers at large M: flatten (B, T, C) -> (B*T, C) and tile M ----
    M = B * T
    tm = 128 if M >= 128 else _round_up(M, 8)
    M_pad = _round_up(M, tm)
    xs = pooled.reshape(M, C)
    if M_pad != M:
        xs = jnp.pad(xs, ((0, M_pad - M), (0, 0)))

    logit_pad, prob_pad = pl.pallas_call(
        _fc_head_kernel,
        out_shape=(jax.ShapeDtypeStruct((M_pad, NCp), jnp.float32),
                   jax.ShapeDtypeStruct((M_pad, NCp), jnp.float32)),
        grid=(M_pad // tm,),
        in_specs=[
            pl.BlockSpec((tm, C), lambda i: (i, 0)),
            pl.BlockSpec((C, C), lambda i: (0, 0)),
            pl.BlockSpec((1, C), lambda i: (0, 0)),
            pl.BlockSpec((C, NCp), lambda i: (0, 0)),
            pl.BlockSpec((1, NCp), lambda i: (0, 0)),
        ],
        out_specs=(pl.BlockSpec((tm, NCp), lambda i: (i, 0)),
                   pl.BlockSpec((tm, NCp), lambda i: (i, 0))),
        compiler_params=pltpu.CompilerParams(
            dimension_semantics=("parallel",)),
    )(xs, w1_bf16, b1_f32.reshape(1, C), w2p_bf16, b2p_f32.reshape(1, NCp))

    seg_logit = logit_pad[:M, :num_classes].reshape(B, T, num_classes)
    seg_out = prob_pad[:M, :num_classes].reshape(B, T, num_classes)
    clip_logit = jnp.max(seg_logit, axis=1)         # torch.max over time
    clip_out = jax.nn.sigmoid(clip_logit)
    return seg_logit, seg_out, clip_logit, clip_out


# -----------------------------------------------------------------------------
# Full model wrapper (matches ResNestSEDMax.forward, eval mode)
# -----------------------------------------------------------------------------
def resnest_sed_max_forward(x, params):
    frames_num = x.shape[3]
    num_classes = params["fca_w"].shape[1]
    NCp = _round_up(num_classes, 128)               # lane-dense class dimension

    enc_w = params["enc_w"].astype(jnp.bfloat16)
    fc1_w = params["fc1_w"].astype(jnp.bfloat16)
    fca_w = jnp.pad(params["fca_w"],
                    ((0, 0), (0, NCp - num_classes))).astype(jnp.bfloat16)
    fca_b = jnp.pad(params["fca_b"], ((0, NCp - num_classes),)).astype(jnp.float32)

    feats = encoder_stub(x, enc_w, params["enc_b"].astype(jnp.float32))  # (B,Hp,T,C)
    seg_logit, seg_out, clip_logit, clip_out = sed_head(
        feats, fc1_w, params["fc1_b"].astype(jnp.float32), fca_w, fca_b,
        num_classes)

    T = seg_out.shape[1]
    ratio = frames_num // T

    def _interp_pad(y):
        up = jnp.repeat(y, ratio, axis=1)           # PANNs-style interpolate
        pad = frames_num - up.shape[1]
        if pad > 0:                                 # pad_framewise_output
            up = jnp.concatenate(
                [up, jnp.repeat(up[:, -1:, :], pad, axis=1)], axis=1)
        return up

    return {
        "framewise_output": _interp_pad(seg_out),
        "segmentwise_output": seg_out,
        "logit": clip_logit,
        "framewise_logit": _interp_pad(seg_logit),
        "clipwise_output": clip_out,
    }


# -----------------------------------------------------------------------------
if __name__ == "__main__":
    # Small but shape-consistent config: input NCHW (B, 3, mel, frames),
    # encoder output stride 32, in_features=C, num_classes=NC (padded to 128
    # inside the wrapper for lane-dense stores).
    B, Cin, H, W = 2, 3, 64, 256
    PATCH = 32
    C = 128          # in_features of the synthetic encoder / fc layers
    NC = 64          # num_classes (reduced from 264 for the demo)

    key = jax.random.PRNGKey(0)
    k_x, k_ew, k_w1, k_w2 = jax.random.split(key, 4)

    x = jax.random.normal(k_x, (B, Cin, H, W), dtype=jnp.float32)

    params = {
        "enc_w": 0.02 * jax.random.normal(k_ew, (Cin * PATCH * PATCH, C), jnp.float32),
        "enc_b": jnp.zeros((C,), jnp.float32),
        "fc1_w": 0.02 * jax.random.normal(k_w1, (C, C), jnp.float32),   # (in, out)
        "fc1_b": jnp.zeros((C,), jnp.float32),
        "fca_w": 0.02 * jax.random.normal(k_w2, (C, NC), jnp.float32),  # (in, out)
        "fca_b": jnp.zeros((NC,), jnp.float32),
    }

    out = resnest_sed_max_forward(x, params)
    jax.block_until_ready(out)

    # light sanity checks on shapes
    T = W // PATCH
    assert out["segmentwise_output"].shape == (B, T, NC)
    assert out["framewise_output"].shape == (B, W, NC)
    assert out["logit"].shape == (B, NC)
    assert out["clipwise_output"].shape == (B, NC)
    assert bool(jnp.all(jnp.isfinite(out["framewise_output"])))
    print("KERNEL_OK")
</pallas_src>

<mosaic_0001>
module attributes {stable_mosaic.version = 11 : i64} {
  func.func @_encoder_matmul_kernel(%arg0: i32, %arg1: memref<32x3072xbf16, #tpu.memory_space<vmem>>, %arg2: memref<3072x128xbf16, #tpu.memory_space<vmem>>, %arg3: memref<1x128xf32, #tpu.memory_space<vmem>>, %arg4: memref<32x128xbf16, #tpu.memory_space<vmem>>) attributes {dimension_semantics = [#tpu.dimension_semantics<parallel>], iteration_bounds = array<i64: 1>, scalar_prefetch = 0 : i64, scratch_operands = 0 : i64, tpu.core_type = #tpu.core_type<tc>, window_params = [{transform_indices = @transform_0, window_bounds = array<i64: 32, 3072>}, {pipeline_mode = #tpu.pipeline_mode<synchronous>, transform_indices = @transform_1, window_bounds = array<i64: 3072, 128>}, {pipeline_mode = #tpu.pipeline_mode<synchronous>, transform_indices = @transform_2, window_bounds = array<i64: 1, 128>}, {transform_indices = @transform_3, window_bounds = array<i64: 32, 128>}]} {
    %c0 = arith.constant 0 : index
    %c0_0 = arith.constant 0 : index
    %0 = vector.load %arg1[%c0, %c0_0] : memref<32x3072xbf16, #tpu.memory_space<vmem>>, vector<32x3072xbf16>
    %c0_1 = arith.constant 0 : index
    %c0_2 = arith.constant 0 : index
    %1 = vector.load %arg2[%c0_1, %c0_2] : memref<3072x128xbf16, #tpu.memory_space<vmem>>, vector<3072x128xbf16>
    %cst = arith.constant dense<0.000000e+00> : vector<32x128xf32>
    %2 = tpu.matmul %0, %1, %cst {dimension_numbers = #tpu.dot_dimension_numbers<[1], [0], [0], [1], [0, 0, 1, 1], [], []>} : vector<32x3072xbf16>, vector<3072x128xbf16>, vector<32x128xf32> -> vector<32x128xf32>
    %c0_3 = arith.constant 0 : index
    %c0_4 = arith.constant 0 : index
    %3 = vector.load %arg3[%c0_3, %c0_4] : memref<1x128xf32, #tpu.memory_space<vmem>>, vector<1x128xf32>
    %4 = vector.broadcast %3 : vector<1x128xf32> to vector<32x128xf32>
    %5 = arith.addf %2, %4 : vector<32x128xf32>
    %cst_5 = arith.constant 0.000000e+00 : f32
    %6 = vector.broadcast %cst_5 : f32 to vector<32x128xf32>
    %7 = arith.maximumf %5, %6 : vector<32x128xf32>
    %8 = arith.truncf %7 : vector<32x128xf32> to vector<32x128xbf16>
    %c0_6 = arith.constant 0 : index
    %c0_7 = arith.constant 0 : index
    %9 = vector.load %arg4[%c0_6, %c0_7] : memref<32x128xbf16, #tpu.memory_space<vmem>>, vector<32x128xbf16>
    tpu.vector_store %arg4[%c0_6, %c0_7], %8 {strides = array<i32>} : memref<32x128xbf16, #tpu.memory_space<vmem>>, vector<32x128xbf16>,
    return
  }
  func.func @transform_0(%arg0: i32) -> (i32, i32) {
    %c0_i32 = arith.constant 0 : i32
    %c0_i32_0 = arith.constant 0 : i32
    return %arg0, %c0_i32 : i32, i32
  }
  func.func @transform_1(%arg0: i32) -> (i32, i32) {
    %c0_i32 = arith.constant 0 : i32
    %c0_i32_0 = arith.constant 0 : i32
    %c0_i32_1 = arith.constant 0 : i32
    return %c0_i32, %c0_i32_0 : i32, i32
  }
  func.func @transform_2(%arg0: i32) -> (i32, i32) {
    %c0_i32 = arith.constant 0 : i32
    %c0_i32_0 = arith.constant 0 : i32
    %c0_i32_1 = arith.constant 0 : i32
    return %c0_i32, %c0_i32_0 : i32, i32
  }
  func.func @transform_3(%arg0: i32) -> (i32, i32) {
    %c0_i32 = arith.constant 0 : i32
    %c0_i32_0 = arith.constant 0 : i32
    return %arg0, %c0_i32 : i32, i32
  }
}

</mosaic_0001>

<bundles_post_ra>
// kernel: tpu_custom_call.1
= control target key start
LH: loop header
LB: loop body
LE: loop exit
PB: predicated region body
PF: predicated region fallthrough
CT: control target
= control target key end

     0   :  { %8 = vsyncpa [#allocation3], 0  ;;  %s3444_s0 = inlined_call_operand.hbm [shape: bf16[32,3072], index: 0, kind: input, shape index: {}]   ;;  %s3445_s1 = inlined_call_operand.hbm [shape: bf16[3072,128], index: 1, kind: input, shape index: {}]   ;;  %s3446_s2 = inlined_call_operand.vmem [shape: f32[1,128], index: 2, kind: input, shape index: {}]   ;;  %s3447_s3 = inlined_call_operand.hbm [shape: bf16[32,128], index: 3, kind: output, shape index: {}]  }
   0x1   :  { %9 = vsyncpa [#allocation6], 0 }
   0x2   :  { %10 = vsyncpa [#allocation4], 0  ;;  %s3372_s12 = smov [#allocation2]   ;;  %s3300_s16 = scalar_lea.hbm %s3444_s0, 6144 }
   0x3   :  { %s16_s13 = sshll.u32 %s3372_s12, 4  ;;  %p3301_p0 = scmp.ne.s32.totalorder %s3444_s0, %s3300_s16  ;;  %s17_s13 = int_to_ptr.vmem [resolvable:$true] %s16_s13 }
   0x4   :  { %p3304_p1 = scmp.lt.u32.totalorder %s3300_s16, %s3444_s0 }
   0x6   :  { %p3306_p2 = pnand %p3304_p1, %p3301_p0 }
   0x8   :  { %3309 = shalt.err (!%p3306_p2)
}
   0x9   :  { %s3310_s21 = scalar_lea.vmem %s17_s13, 6144  ;;  %p3315_p4 = scmp.lt.s32.totalorder %s17_s13, %s17_s13 }
   0xa   :  { %p3311_p3 = scmp.ne.s32.totalorder %s17_s13, %s3310_s21  ;;  %p3316_p5 = scmp.lt.s32.totalorder %s3310_s21, %s3310_s21 }
   0xc   :  { %p3317_p6 = por %p3316_p5, %p3315_p4 }
   0xe   :  { %p3318_p7 = pnand %p3317_p6, %p3311_p3 }
  0x10   :  { %3321 = shalt.err (!%p3318_p7)
}
  0x11   :  { %s3373_s22 = smov 1536   ;;  %s3374_s23 = smov 96  }
  0x12   :  { %22 = dma.hbm_to_vmem [thread:$0]  %s3444_s0, 6144, %s17_s13, [#allocation3], %s3373_s22, %s3373_s22, %s3374_s23  }
  0x13   :  { %s3375_s26 = smov [#allocation5]   ;;  %s3322_s30 = scalar_lea.hbm %s3445_s1, 24576 }
  0x14   :  { %s28_s27 = sshll.u32 %s3375_s26, 4  ;;  %p3323_p8 = scmp.ne.s32.totalorder %s3445_s1, %s3322_s30  ;;  %s29_s27 = int_to_ptr.vmem [resolvable:$true] %s28_s27 }
  0x15   :  { %p3326_p9 = scmp.lt.u32.totalorder %s3322_s30, %s3445_s1 }
  0x17   :  { %p3328_p10 = pnand %p3326_p9, %p3323_p8 }
  0x19   :  { %3331 = shalt.err (!%p3328_p10)
}
  0x1a   :  { %s3332_s8 = scalar_lea.vmem %s29_s27, 24576  ;;  %p3337_p12 = scmp.lt.s32.totalorder %s29_s27, %s29_s27 }
  0x1b   :  { %p3333_p11 = scmp.ne.s32.totalorder %s29_s27, %s3332_s8  ;;  %p3338_p13 = scmp.lt.s32.totalorder %s3332_s8, %s3332_s8 }
  0x1d   :  { %p3339_p0 = por %p3338_p13, %p3337_p12 }
  0x1f   :  { %p3340_p1 = pnand %p3339_p0, %p3333_p11 }
  0x21   :  { %3343 = shalt.err (!%p3340_p1)
}
  0x22   :  { %s3376_s0 = smov 64   ;;  %s3377_s9 = smov 4  }
  0x23   :  { %34 = dma.hbm_to_vmem [thread:$0]  %s3445_s1, 24576, %s29_s27, [#allocation6], %s3376_s0, %s3376_s0, %s3377_s9  }
  0x24   :  { %3366 = dma.done.wait [#allocation3], 6144  }
  0x25   :  { %3367 = vsyncadd [#allocation3], 4294961152 }
  0x26   :  { %3368 = dma.done.wait [#allocation6], 24576  }
  0x27   :  { %3369 = vsyncadd [#allocation6], 4294942720  ;;  %v3108_v0 = vld [vmem:[#allocation5 + $0x40] sm:$0xff]   ;;  %v3112_v4 = vld [vmem:[#allocation5 + $0x48] sm:$0xff]  }
  0x28   :  { %v3109_v1 = vld [vmem:[#allocation5 + $0xc0] sm:$0xff]   ;;  %2765 = vmatprep.subr.bf16.mxu0 %v3108_v0  ;;  %v3113_v5 = vld [vmem:[#allocation5 + $0xc8] sm:$0xff]   ;;  %v3116_v8 = vld [vmem:[#allocation5 + $0x50] sm:$0xff]  }
  0x29   :  { %v3110_v2 = vld [vmem:[#allocation5] sm:$0xff]   ;;  %2793 = vmatprep.subr.bf16.mxu1 %v3109_v1  ;;  %v3114_v6 = vld [vmem:[#allocation5 + $0x8] sm:$0xff]   ;;  %v3117_v9 = vld [vmem:[#allocation5 + $0xd0] sm:$0xff]  }
  0x2a   :  { %v3111_v3 = vld [vmem:[#allocation5 + $0x80] sm:$0xff]   ;;  %2766 = vmatpush3.bf16.msra.mxu0 %v3110_v2  ;;  %v3115_v7 = vld [vmem:[#allocation5 + $0x88] sm:$0xff]   ;;  %v3118_v10 = vld [vmem:[#allocation5 + $0x10] sm:$0xff]  }
  0x2b   :  { %2794 = vmatpush3.bf16.msra.mxu1 %v3111_v3  ;;  %2767 = vmatprep.subr.bf16.mxu0 %v3112_v4  ;;  %v3119_v11 = vld [vmem:[#allocation5 + $0x90] sm:$0xff]   ;;  %v3120_v12 = vld [vmem:[#allocation5 + $0x58] sm:$0xff]   ;;  %v3124_v16 = vld [vmem:[#allocation5 + $0x60] sm:$0xff]  }
  0x2c   :  { %2795 = vmatprep.subr.bf16.mxu1 %v3113_v5  ;;  %v3121_v13 = vld [vmem:[#allocation5 + $0xd8] sm:$0xff]   ;;  %v3125_v17 = vld [vmem:[#allocation5 + $0xe0] sm:$0xff]   ;;  %v3128_v20 = vld [vmem:[#allocation5 + $0x68] sm:$0xff]  }
  0x2d   :  { %v3122_v14 = vld [vmem:[#allocation5 + $0x18] sm:$0xff]   ;;  %v3126_v18 = vld [vmem:[#allocation5 + $0x20] sm:$0xff]   ;;  %v3129_v21 = vld [vmem:[#allocation5 + $0xe8] sm:$0xff]  }
  0x2e   :  { %2768 = vmatpush3.bf16.msra.mxu0 %v3114_v6  ;;  %v3123_v15 = vld [vmem:[#allocation5 + $0x98] sm:$0xff]   ;;  %v3127_v19 = vld [vmem:[#allocation5 + $0xa0] sm:$0xff]   ;;  %v3130_v22 = vld [vmem:[#allocation5 + $0x28] sm:$0xff]  }
  0x2f   :  { %2796 = vmatpush3.bf16.msra.mxu1 %v3115_v7  ;;  %2769 = vmatprep.subr.bf16.mxu0 %v3116_v8  ;;  %v3131_v23 = vld [vmem:[#allocation5 + $0xa8] sm:$0xff]   ;;  %v3132_v24 = vld [vmem:[#allocation5 + $0x70] sm:$0xff]   ;;  %v3136_v28 = vld [vmem:[#allocation5 + $0x78] sm:$0xff]  }
  0x30   :  { %2797 = vmatprep.subr.bf16.mxu1 %v3117_v9  ;;  %v3133_v25 = vld [vmem:[#allocation5 + $0xf0] sm:$0xff]   ;;  %v3137_v29 = vld [vmem:[#allocation5 + $0xf8] sm:$0xff]   ;;  %v44_v32 = vld [vmem:[#allocation2] sm:$0xff] }
  0x31   :  { %v3134_v26 = vld [vmem:[#allocation5 + $0x30] sm:$0xff]   ;;  %v3138_v30 = vld [vmem:[#allocation5 + $0x38] sm:$0xff]   ;;  %v56_v33 = vld [vmem:[#allocation2 + $0x60] sm:$0xff] }
  0x32   :  { %2770 = vmatpush3.bf16.msra.mxu0 %v3118_v10  ;;  %v3135_v27 = vld [vmem:[#allocation5 + $0xb0] sm:$0xff]   ;;  %v3139_v31 = vld [vmem:[#allocation5 + $0xb8] sm:$0xff]   ;;  %v45_v34 = vld [vmem:[#allocation2 + $0x8] sm:$0xff]  ;;  %v2506_v35 = vcombine.low %v44_v32, %v56_v33  ;;  %v2507_v36 = vcombine.high %v44_v32, %v56_v33 }
  0x33   :  { %2798 = vmatpush3.bf16.msra.mxu1 %v3119_v11  ;;  %2771 = vmatprep.subr.bf16.mxu0 %v3120_v12  ;;  %v57_v37 = vld [vmem:[#allocation2 + $0x68] sm:$0xff]  ;;  %v3140_v40 = vld [vmem:[#allocation5 + $0x140] sm:$0xff]   ;;  %v3148_v48 = vld [vmem:[#allocation5 + $0x150] sm:$0xff]  }
  0x34   :  { %2799 = vmatprep.subr.bf16.mxu1 %v3121_v13  ;;  %v2508_v38 = vcombine.low %v45_v34, %v57_v37  ;;  %v2509_v39 = vcombine.high %v45_v34, %v57_v37  ;;  %1907 = vmatprep.mubr.bf16.mxu0 %v2507_v36  ;;  %v3141_v41 = vld [vmem:[#allocation5 + $0x1c0] sm:$0xff]   ;;  %v3144_v44 = vld [vmem:[#allocation5 + $0x148] sm:$0xff]   ;;  %v3149_v49 = vld [vmem:[#allocation5 + $0x1d0] sm:$0xff]  }
  0x35   :  { %v3142_v42 = vld [vmem:[#allocation5 + $0x100] sm:$0xff]   ;;  %v3145_v45 = vld [vmem:[#allocation5 + $0x1c8] sm:$0xff]   ;;  %v3150_v50 = vld [vmem:[#allocation5 + $0x110] sm:$0xff]  }
  0x36   :  { %2772 = vmatpush3.bf16.msra.mxu0 %v3122_v14  ;;  %1956 = vmatprep.mubr.bf16.mxu1 %v2509_v39  ;;  %v3143_v43 = vld [vmem:[#allocation5 + $0x180] sm:$0xff]   ;;  %v3146_v46 = vld [vmem:[#allocation5 + $0x108] sm:$0xff]   ;;  %v3151_v51 = vld [vmem:[#allocation5 + $0x190] sm:$0xff]  }
  0x37   :  { %2800 = vmatpush3.bf16.msra.mxu1 %v3123_v15  ;;  %2773 = vmatprep.subr.bf16.mxu0 %v3124_v16  ;;  %v3147_v47 = vld [vmem:[#allocation5 + $0x188] sm:$0xff]   ;;  %v3152_v52 = vld [vmem:[#allocation5 + $0x158] sm:$0xff]   ;;  %v3156_v56 = vld [vmem:[#allocation5 + $0x160] sm:$0xff]  }
  0x38   :  { %2801 = vmatprep.subr.bf16.mxu1 %v3125_v17  ;;  %v3153_v53 = vld [vmem:[#allocation5 + $0x1d8] sm:$0xff]   ;;  %v3157_v57 = vld [vmem:[#allocation5 + $0x1e0] sm:$0xff]   ;;  %v3160_v60 = vld [vmem:[#allocation5 + $0x168] sm:$0xff]  }
  0x39   :  { %v3154_v54 = vld [vmem:[#allocation5 + $0x118] sm:$0xff]   ;;  %v3158_v58 = vld [vmem:[#allocation5 + $0x120] sm:$0xff]   ;;  %v3161_v61 = vld [vmem:[#allocation5 + $0x1e8] sm:$0xff]  }
  0x3a   :  { %2774 = vmatpush3.bf16.msra.mxu0 %v3126_v18  ;;  %v3155_v55 = vld [vmem:[#allocation5 + $0x198] sm:$0xff]   ;;  %v3159_v59 = vld [vmem:[#allocation5 + $0x1a0] sm:$0xff]   ;;  %v3162_v1 = vld [vmem:[#allocation5 + $0x128] sm:$0xff]  }
  0x3b   :  { %2802 = vmatpush3.bf16.msra.mxu1 %v3127_v19  ;;  %2775 = vmatprep.subr.bf16.mxu0 %v3128_v20  ;;  %v68_v62 = vld [vmem:[#allocation2 + $0xc0] sm:$0xff]  ;;  %v3163_v3 = vld [vmem:[#allocation5 + $0x1a8] sm:$0xff]   ;;  %v3164_v8 = vld [vmem:[#allocation5 + $0x170] sm:$0xff]  }
  0x3c   :  { %2803 = vmatprep.subr.bf16.mxu1 %v3129_v21  ;;  %v80_v63 = vld [vmem:[#allocation2 + $0x120] sm:$0xff]  ;;  %v69_v4 = vld [vmem:[#allocation2 + $0xc8] sm:$0xff]  ;;  %v3165_v9 = vld [vmem:[#allocation5 + $0x1f0] sm:$0xff]  }
  0x3d   :  { %v2531_v0 = vcombine.high %v68_v62, %v80_v63  ;;  %v2530_v2 = vcombine.low %v68_v62, %v80_v63  ;;  %v81_v5 = vld [vmem:[#allocation2 + $0x128] sm:$0xff]  ;;  %v3166_v10 = vld [vmem:[#allocation5 + $0x130] sm:$0xff]   ;;  %v3168_v12 = vld [vmem:[#allocation5 + $0x178] sm:$0xff]  }
  0x3e   :  { %2776 = vmatpush3.bf16.msra.mxu0 %v3130_v22  ;;  %v2533_v6 = vcombine.high %v69_v4, %v81_v5  ;;  %v2532_v7 = vcombine.low %v69_v4, %v81_v5  ;;  %v3167_v11 = vld [vmem:[#allocation5 + $0x1b0] sm:$0xff]   ;;  %v3169_v13 = vld [vmem:[#allocation5 + $0x1f8] sm:$0xff]   ;;  %v49_v4 = vld [vmem:[#allocation2 + $0x28] sm:$0xff] }
  0x3f   :  { %2804 = vmatpush3.bf16.msra.mxu1 %v3131_v23  ;;  %2777 = vmatprep.subr.bf16.mxu0 %v3132_v24  ;;  %v3170_v14 = vld [vmem:[#allocation5 + $0x138] sm:$0xff]   ;;  %v46_v16 = vld [vmem:[#allocation2 + $0x10] sm:$0xff]  ;;  %v3172_v24 = vld [vmem:[#allocation5 + $0x240] sm:$0xff]  }
  0x40   :  { %2805 = vmatprep.subr.bf16.mxu1 %v3133_v25  ;;  %v3171_v15 = vld [vmem:[#allocation5 + $0x1b8] sm:$0xff]   ;;  %v58_v17 = vld [vmem:[#allocation2 + $0x70] sm:$0xff]  ;;  %v3173_v25 = vld [vmem:[#allocation5 + $0x2c0] sm:$0xff]  }
  0x41   :  { %v47_v18 = vld [vmem:[#allocation2 + $0x18] sm:$0xff]  ;;  %v2510_v20 = vcombine.low %v46_v16, %v58_v17  ;;  %v2511_v21 = vcombine.high %v46_v16, %v58_v17  ;;  %v70_v32 = vld [vmem:[#allocation2 + $0xd0] sm:$0xff]  ;;  %v61_v5 = vld [vmem:[#allocation2 + $0x88] sm:$0xff] }
  0x42   :  { %2778 = vmatpush3.bf16.msra.mxu0 %v3134_v26  ;;  %v59_v19 = vld [vmem:[#allocation2 + $0x78] sm:$0xff]  ;;  %v3174_v26 = vld [vmem:[#allocation5 + $0x200] sm:$0xff]   ;;  %v82_v33 = vld [vmem:[#allocation2 + $0x130] sm:$0xff] }
  0x43   :  { %2806 = vmatpush3.bf16.msra.mxu1 %v3135_v27  ;;  %2779 = vmatprep.subr.bf16.mxu0 %v3136_v28  ;;  %v2512_v22 = vcombine.low %v47_v18, %v59_v19  ;;  %v2513_v23 = vcombine.high %v47_v18, %v59_v19  ;;  %v3175_v27 = vld [vmem:[#allocation5 + $0x280] sm:$0xff]   ;;  %v3176_v28 = vld [vmem:[#allocation5 + $0x248] sm:$0xff]   ;;  %v2535_v34 = vcombine.high %v70_v32, %v82_v33  ;;  %v3180_v36 = vld [vmem:[#allocation5 + $0x250] sm:$0xff]  }
  0x44   :  { %2807 = vmatprep.subr.bf16.mxu1 %v3137_v29  ;;  %v3177_v29 = vld [vmem:[#allocation5 + $0x2c8] sm:$0xff]   ;;  %v3181_v37 = vld [vmem:[#allocation5 + $0x2d0] sm:$0xff]   ;;  %v83_v39 = vld [vmem:[#allocation2 + $0x138] sm:$0xff] }
  0x45   :  { %v3202_v62 = vld [vmem:[#allocation5 + $0x238] sm:$0xff]   ;;  %v72_v16 = vld [vmem:[#allocation2 + $0xe0] sm:$0xff] }
  0x46   :  { %2780 = vmatpush3.bf16.msra.mxu0 %v3138_v30  ;;  %v3178_v30 = vld [vmem:[#allocation5 + $0x208] sm:$0xff]   ;;  %v3203_v63 = vld [vmem:[#allocation5 + $0x2b8] sm:$0xff]   ;;  %v84_v17 = vld [vmem:[#allocation2 + $0x140] sm:$0xff] }
  0x47   :  { %2808 = vmatpush3.bf16.msra.mxu1 %v3139_v31  ;;  %2821 = vmatprep.subr.bf16.mxu0 %v3140_v40  ;;  %v3179_v31 = vld [vmem:[#allocation5 + $0x288] sm:$0xff]   ;;  %v2539_v18 = vcombine.high %v72_v16, %v84_v17  ;;  %v2538_v19 = vcombine.low %v72_v16, %v84_v17  ;;  %v3252_v16 = vld [vmem:[#allocation5 + $0x460] sm:$0xff]  }
  0x48   :  { %2849 = vmatprep.subr.bf16.mxu1 %v3141_v41  ;;  %v3182_v41 = vld [vmem:[#allocation5 + $0x210] sm:$0xff]   ;;  %v3253_v17 = vld [vmem:[#allocation5 + $0x4e0] sm:$0xff]  }
  0x49   :  { %1908 = vmatmul.mubr.bf16.vlgmr.msra.gmra.mrb[0].mxu0 %v2506_v35  ;;  %v2534_v35 = vcombine.low %v70_v32, %v82_v33  ;;  %v3220_v32 = vld [vmem:[#allocation5 + $0x360] sm:$0xff]  }
  0x4a   :  { %1957 = vmatmul.mubr.bf16.vlgmr.msra.gmra.mrb[0].mxu1 %v2508_v38  ;;  %2822 = vmatpush3.bf16.msra.mxu0 %v3142_v42  ;;  %v71_v38 = vld [vmem:[#allocation2 + $0xd8] sm:$0xff]  ;;  %v3221_v33 = vld [vmem:[#allocation5 + $0x3e0] sm:$0xff]  }
  0x4b   :  { %2850 = vmatpush3.bf16.msra.mxu1 %v3143_v43  ;;  %2823 = vmatprep.subr.bf16.mxu0 %v3144_v44  ;;  %v2537_v40 = vcombine.high %v71_v38, %v83_v39  ;;  %v2536_v42 = vcombine.low %v71_v38, %v83_v39  ;;  %v3183_v43 = vld [vmem:[#allocation5 + $0x290] sm:$0xff]   ;;  %v3184_v44 = vld [vmem:[#allocation5 + $0x258] sm:$0xff]   ;;  %v3226_v38 = vld [vmem:[#allocation5 + $0x328] sm:$0xff]  }
  0x4c   :  { %2851 = vmatprep.subr.bf16.mxu1 %v3145_v45  ;;  %1915 = vmatprep.mubr.bf16.mxu0 %v2531_v0  ;;  %v3185_v45 = vld [vmem:[#allocation5 + $0x2d8] sm:$0xff]   ;;  %v48_v0 = vld [vmem:[#allocation2 + $0x20] sm:$0xff]  ;;  %v3227_v39 = vld [vmem:[#allocation5 + $0x3a8] sm:$0xff]  }
  0x4d   :  { %1964 = vmatprep.mubr.bf16.mxu1 %v2533_v6  ;;  %v2516_v6 = vcombine.low %v49_v4, %v61_v5 }
  0x4e   :  { %2824 = vmatpush3.bf16.msra.mxu0 %v3146_v46  ;;  %v3186_v46 = vld [vmem:[#allocation5 + $0x218] sm:$0xff]  }
  0x4f   :  { %2852 = vmatpush3.bf16.msra.mxu1 %v3147_v47  ;;  %2825 = vmatprep.subr.bf16.mxu0 %v3148_v48  ;;  %v3187_v47 = vld [vmem:[#allocation5 + $0x298] sm:$0xff]   ;;  %v3188_v48 = vld [vmem:[#allocation5 + $0x260] sm:$0xff]  }
  0x50   :  { %2853 = vmatprep.subr.bf16.mxu1 %v3149_v49  ;;  %v3189_v49 = vld [vmem:[#allocation5 + $0x2e0] sm:$0xff]  }
  0x51   :  { %1916 = vmatmul.mubr.bf16.gmra.mrb[4].mxu0 %v2530_v2 }
  0x52   :  { %2826 = vmatpush3.bf16.msra.mxu0 %v3150_v50  ;;  %1965 = vmatmul.mubr.bf16.gmra.mrb[4].mxu1 %v2532_v7  ;;  %v3190_v50 = vld [vmem:[#allocation5 + $0x220] sm:$0xff]   ;;  %v2517_v7 = vcombine.high %v49_v4, %v61_v5  ;;  %v3244_v4 = vld [vmem:[#allocation5 + $0x450] sm:$0xff]  }
  0x53   :  { %2854 = vmatpush3.bf16.msra.mxu1 %v3151_v51  ;;  %2827 = vmatprep.subr.bf16.mxu0 %v3152_v52  ;;  %v3191_v51 = vld [vmem:[#allocation5 + $0x2a0] sm:$0xff]   ;;  %v3192_v52 = vld [vmem:[#allocation5 + $0x268] sm:$0xff]   ;;  %v3245_v5 = vld [vmem:[#allocation5 + $0x4d0] sm:$0xff]  }
  0x54   :  { %2855 = vmatprep.subr.bf16.mxu1 %v3153_v53  ;;  %2005 = vmatprep.mubr.bf16.mxu0 %v2511_v21  ;;  %v3193_v53 = vld [vmem:[#allocation5 + $0x2e8] sm:$0xff]   ;;  %v3213_v21 = vld [vmem:[#allocation5 + $0x3d0] sm:$0xff]  }
  0x55   :  { %2054 = vmatprep.mubr.bf16.mxu1 %v2513_v23  ;;  %v85_v23 = vld [vmem:[#allocation2 + $0x148] sm:$0xff] }
  0x56   :  { %2828 = vmatpush3.bf16.msra.mxu0 %v3154_v54  ;;  %v3194_v54 = vld [vmem:[#allocation5 + $0x228] sm:$0xff]  }
  0x57   :  { %2856 = vmatpush3.bf16.msra.mxu1 %v3155_v55  ;;  %2829 = vmatprep.subr.bf16.mxu0 %v3156_v56  ;;  %v3195_v55 = vld [vmem:[#allocation5 + $0x2a8] sm:$0xff]   ;;  %v3196_v56 = vld [vmem:[#allocation5 + $0x270] sm:$0xff]  }
  0x58   :  { %2857 = vmatprep.subr.bf16.mxu1 %v3157_v57  ;;  %v3197_v57 = vld [vmem:[#allocation5 + $0x2f0] sm:$0xff]  }
  0x5a   :  { %2830 = vmatpush3.bf16.msra.mxu0 %v3158_v58  ;;  %v3198_v58 = vld [vmem:[#allocation5 + $0x230] sm:$0xff]  }
  0x5b   :  { %2858 = vmatpush3.bf16.msra.mxu1 %v3159_v59  ;;  %2831 = vmatprep.subr.bf16.mxu0 %v3160_v60  ;;  %v3199_v59 = vld [vmem:[#allocation5 + $0x2b0] sm:$0xff]   ;;  %v3200_v60 = vld [vmem:[#allocation5 + $0x278] sm:$0xff]  }
  0x5c   :  { %2859 = vmatprep.subr.bf16.mxu1 %v3161_v61  ;;  %v3201_v61 = vld [vmem:[#allocation5 + $0x2f8] sm:$0xff]  }
  0x5e   :  { %2832 = vmatpush3.bf16.msra.mxu0 %v3162_v1  ;;  %v60_v1 = vld [vmem:[#allocation2 + $0x80] sm:$0xff] }
  0x5f   :  { %2860 = vmatpush3.bf16.msra.mxu1 %v3163_v3  ;;  %2833 = vmatprep.subr.bf16.mxu0 %v3164_v8  ;;  %v2514_v2 = vcombine.low %v48_v0, %v60_v1  ;;  %v2515_v3 = vcombine.high %v48_v0, %v60_v1  ;;  %v3204_v8 = vld [vmem:[#allocation5 + $0x340] sm:$0xff]   ;;  %v74_v0 = vld [vmem:[#allocation2 + $0xf0] sm:$0xff] }
  0x60   :  { %2861 = vmatprep.subr.bf16.mxu1 %v3165_v9  ;;  %v3205_v9 = vld [vmem:[#allocation5 + $0x3c0] sm:$0xff]   ;;  %v86_v1 = vld [vmem:[#allocation2 + $0x150] sm:$0xff] }
  0x62   :  { %2834 = vmatpush3.bf16.msra.mxu0 %v3166_v10  ;;  %v3206_v10 = vld [vmem:[#allocation5 + $0x300] sm:$0xff]  }
  0x63   :  { %2862 = vmatpush3.bf16.msra.mxu1 %v3167_v11  ;;  %2835 = vmatprep.subr.bf16.mxu0 %v3168_v12  ;;  %v3207_v11 = vld [vmem:[#allocation5 + $0x380] sm:$0xff]   ;;  %v3208_v12 = vld [vmem:[#allocation5 + $0x348] sm:$0xff]  }
  0x64   :  { %2863 = vmatprep.subr.bf16.mxu1 %v3169_v13  ;;  %v3209_v13 = vld [vmem:[#allocation5 + $0x3c8] sm:$0xff]  }
  0x66   :  { %2836 = vmatpush3.bf16.msra.mxu0 %v3170_v14  ;;  %v3210_v14 = vld [vmem:[#allocation5 + $0x308] sm:$0xff]  }
  0x67   :  { %2864 = vmatpush3.bf16.msra.mxu1 %v3171_v15  ;;  %2877 = vmatprep.subr.bf16.mxu0 %v3172_v24  ;;  %v3211_v15 = vld [vmem:[#allocation5 + $0x388] sm:$0xff]  }
  0x68   :  { %2905 = vmatprep.subr.bf16.mxu1 %v3173_v25  ;;  %v3214_v25 = vld [vmem:[#allocation5 + $0x310] sm:$0xff]  }
  0x69   :  { %2006 = vmatmul.mubr.bf16.vlgmr.msra.gmra.mrb[8].mxu0 %v2510_v20  ;;  %v3212_v20 = vld [vmem:[#allocation5 + $0x350] sm:$0xff]  }
  0x6a   :  { %2055 = vmatmul.mubr.bf16.vlgmr.msra.gmra.mrb[8].mxu1 %v2512_v22  ;;  %2878 = vmatpush3.bf16.msra.mxu0 %v3174_v26  ;;  %v73_v22 = vld [vmem:[#allocation2 + $0xe8] sm:$0xff] }
  0x6b   :  { %2906 = vmatpush3.bf16.msra.mxu1 %v3175_v27  ;;  %2879 = vmatprep.subr.bf16.mxu0 %v3176_v28  ;;  %v2541_v24 = vcombine.high %v73_v22, %v85_v23  ;;  %v2540_v26 = vcombine.low %v73_v22, %v85_v23  ;;  %v3215_v27 = vld [vmem:[#allocation5 + $0x390] sm:$0xff]   ;;  %v3216_v28 = vld [vmem:[#allocation5 + $0x358] sm:$0xff]   ;;  %v3258_v22 = vld [vmem:[#allocation5 + $0x428] sm:$0xff]  }
  0x6c   :  { %2907 = vmatprep.subr.bf16.mxu1 %v3177_v29  ;;  %2013 = vmatprep.mubr.bf16.mxu0 %v2535_v34  ;;  %v3217_v29 = vld [vmem:[#allocation5 + $0x3d8] sm:$0xff]   ;;  %v3222_v34 = vld [vmem:[#allocation5 + $0x320] sm:$0xff]   ;;  %v3259_v23 = vld [vmem:[#allocation5 + $0x4a8] sm:$0xff]  }
  0x6d   :  { %2062 = vmatprep.mubr.bf16.mxu1 %v2537_v40  ;;  %v3228_v40 = vld [vmem:[#allocation5 + $0x370] sm:$0xff]  }
  0x6e   :  { %2880 = vmatpush3.bf16.msra.mxu0 %v3178_v30  ;;  %v3218_v30 = vld [vmem:[#allocation5 + $0x318] sm:$0xff]  }
  0x6f   :  { %2908 = vmatpush3.bf16.msra.mxu1 %v3179_v31  ;;  %2881 = vmatprep.subr.bf16.mxu0 %v3180_v36  ;;  %v3219_v31 = vld [vmem:[#allocation5 + $0x398] sm:$0xff]   ;;  %v3224_v36 = vld [vmem:[#allocation5 + $0x368] sm:$0xff]  }
  0x70   :  { %2909 = vmatprep.subr.bf16.mxu1 %v3181_v37  ;;  %v3225_v37 = vld [vmem:[#allocation5 + $0x3e8] sm:$0xff]  }
  0x71   :  { %2014 = vmatmul.mubr.bf16.gmra.mrb[12].mxu0 %v2534_v35  ;;  %v3223_v35 = vld [vmem:[#allocation5 + $0x3a0] sm:$0xff]  }
  0x72   :  { %2882 = vmatpush3.bf16.msra.mxu0 %v3182_v41  ;;  %2063 = vmatmul.mubr.bf16.gmra.mrb[12].mxu1 %v2536_v42  ;;  %v3229_v41 = vld [vmem:[#allocation5 + $0x3f0] sm:$0xff]  }
  0x73   :  { %2910 = vmatpush3.bf16.msra.mxu1 %v3183_v43  ;;  %2883 = vmatprep.subr.bf16.mxu0 %v3184_v44  ;;  %v3230_v42 = vld [vmem:[#allocation5 + $0x330] sm:$0xff]   ;;  %v3232_v44 = vld [vmem:[#allocation5 + $0x378] sm:$0xff]  }
  0x74   :  { %2911 = vmatprep.subr.bf16.mxu1 %v3185_v45  ;;  %2103 = vmatprep.mubr.bf16.mxu0 %v2515_v3  ;;  %v3231_v43 = vld [vmem:[#allocation5 + $0x3b0] sm:$0xff]   ;;  %v3233_v45 = vld [vmem:[#allocation5 + $0x3f8] sm:$0xff]   ;;  %v2542_v3 = vcombine.low %v74_v0, %v86_v1 }
  0x75   :  { %2152 = vmatprep.mubr.bf16.mxu1 %v2517_v7  ;;  %v87_v7 = vld [vmem:[#allocation2 + $0x158] sm:$0xff] }
  0x76   :  { %2884 = vmatpush3.bf16.msra.mxu0 %v3186_v46  ;;  %v3234_v46 = vld [vmem:[#allocation5 + $0x338] sm:$0xff]  }
  0x77   :  { %2912 = vmatpush3.bf16.msra.mxu1 %v3187_v47  ;;  %2885 = vmatprep.subr.bf16.mxu0 %v3188_v48  ;;  %v3235_v47 = vld [vmem:[#allocation5 + $0x3b8] sm:$0xff]   ;;  %v50_v48 = vld [vmem:[#allocation2 + $0x30] sm:$0xff] }
  0x78   :  { %2913 = vmatprep.subr.bf16.mxu1 %v3189_v49  ;;  %v62_v49 = vld [vmem:[#allocation2 + $0x90] sm:$0xff] }
  0x7a   :  { %2886 = vmatpush3.bf16.msra.mxu0 %v3190_v50  ;;  %v51_v50 = vld [vmem:[#allocation2 + $0x38] sm:$0xff] }
  0x7b   :  { %2914 = vmatpush3.bf16.msra.mxu1 %v3191_v51  ;;  %2887 = vmatprep.subr.bf16.mxu0 %v3192_v52  ;;  %v2518_v51 = vcombine.low %v50_v48, %v62_v49  ;;  %v2519_v52 = vcombine.high %v50_v48, %v62_v49  ;;  %v76_v48 = vld [vmem:[#allocation2 + $0x100] sm:$0xff] }
  0x7c   :  { %2915 = vmatprep.subr.bf16.mxu1 %v3193_v53  ;;  %v63_v53 = vld [vmem:[#allocation2 + $0x98] sm:$0xff]  ;;  %v88_v49 = vld [vmem:[#allocation2 + $0x160] sm:$0xff] }
  0x7e   :  { %2888 = vmatpush3.bf16.msra.mxu0 %v3194_v54  ;;  %v2520_v54 = vcombine.low %v51_v50, %v63_v53 }
  0x7f   :  { %2916 = vmatpush3.bf16.msra.mxu1 %v3195_v55  ;;  %2889 = vmatprep.subr.bf16.mxu0 %v3196_v56  ;;  %v2521_v55 = vcombine.high %v51_v50, %v63_v53  ;;  %v3236_v56 = vld [vmem:[#allocation5 + $0x440] sm:$0xff]   ;;  %v2547_v50 = vcombine.high %v76_v48, %v88_v49  ;;  %v3277_v53 = vld [vmem:[#allocation5 + $0x5d0] sm:$0xff]  }
  0x80   :  { %2917 = vmatprep.subr.bf16.mxu1 %v3197_v57  ;;  %v3237_v57 = vld [vmem:[#allocation5 + $0x4c0] sm:$0xff]  }
  0x82   :  { %2890 = vmatpush3.bf16.msra.mxu0 %v3198_v58  ;;  %v3238_v58 = vld [vmem:[#allocation5 + $0x400] sm:$0xff]  }
  0x83   :  { %2918 = vmatpush3.bf16.msra.mxu1 %v3199_v59  ;;  %2891 = vmatprep.subr.bf16.mxu0 %v3200_v60  ;;  %v3239_v59 = vld [vmem:[#allocation5 + $0x480] sm:$0xff]   ;;  %v3240_v60 = vld [vmem:[#allocation5 + $0x448] sm:$0xff]  }
  0x84   :  { %2919 = vmatprep.subr.bf16.mxu1 %v3201_v61  ;;  %v3241_v61 = vld [vmem:[#allocation5 + $0x4c8] sm:$0xff]  }
  0x86   :  { %2892 = vmatpush3.bf16.msra.mxu0 %v3202_v62  ;;  %v3242_v62 = vld [vmem:[#allocation5 + $0x408] sm:$0xff]  }
  0x87   :  { %2920 = vmatpush3.bf16.msra.mxu1 %v3203_v63  ;;  %2933 = vmatprep.subr.bf16.mxu0 %v3204_v8  ;;  %v3243_v63 = vld [vmem:[#allocation5 + $0x488] sm:$0xff]  }
  0x88   :  { %2961 = vmatprep.subr.bf16.mxu1 %v3205_v9  ;;  %v3246_v9 = vld [vmem:[#allocation5 + $0x410] sm:$0xff]  }
  0x89   :  { %2104 = vmatmul.mubr.bf16.vlgmr.msra.gmra.mrb[16].mxu0 %v2514_v2  ;;  %v2543_v2 = vcombine.high %v74_v0, %v86_v1  ;;  %v3284_v0 = vld [vmem:[#allocation5 + $0x560] sm:$0xff]  }
  0x8a   :  { %2153 = vmatmul.mubr.bf16.vlgmr.msra.gmra.mrb[16].mxu1 %v2516_v6  ;;  %2934 = vmatpush3.bf16.msra.mxu0 %v3206_v10  ;;  %v75_v6 = vld [vmem:[#allocation2 + $0xf8] sm:$0xff]  ;;  %v3285_v1 = vld [vmem:[#allocation5 + $0x5e0] sm:$0xff]  }
  0x8b   :  { %2962 = vmatpush3.bf16.msra.mxu1 %v3207_v11  ;;  %2935 = vmatprep.subr.bf16.mxu0 %v3208_v12  ;;  %v2545_v8 = vcombine.high %v75_v6, %v87_v7  ;;  %v2544_v10 = vcombine.low %v75_v6, %v87_v7  ;;  %v3247_v11 = vld [vmem:[#allocation5 + $0x490] sm:$0xff]   ;;  %v3248_v12 = vld [vmem:[#allocation5 + $0x458] sm:$0xff]   ;;  %v3290_v6 = vld [vmem:[#allocation5 + $0x528] sm:$0xff]  }
  0x8c   :  { %2963 = vmatprep.subr.bf16.mxu1 %v3209_v13  ;;  %2111 = vmatprep.mubr.bf16.mxu0 %v2539_v18  ;;  %v3249_v13 = vld [vmem:[#allocation5 + $0x4d8] sm:$0xff]   ;;  %v3254_v18 = vld [vmem:[#allocation5 + $0x420] sm:$0xff]   ;;  %v3291_v7 = vld [vmem:[#allocation5 + $0x5a8] sm:$0xff]  }
  0x8d   :  { %2160 = vmatprep.mubr.bf16.mxu1 %v2541_v24  ;;  %v3260_v24 = vld [vmem:[#allocation5 + $0x470] sm:$0xff]  }
  0x8e   :  { %2936 = vmatpush3.bf16.msra.mxu0 %v3210_v14  ;;  %v3250_v14 = vld [vmem:[#allocation5 + $0x418] sm:$0xff]  }
  0x8f   :  { %2964 = vmatpush3.bf16.msra.mxu1 %v3211_v15  ;;  %2937 = vmatprep.subr.bf16.mxu0 %v3212_v20  ;;  %v3251_v15 = vld [vmem:[#allocation5 + $0x498] sm:$0xff]   ;;  %v3256_v20 = vld [vmem:[#allocation5 + $0x468] sm:$0xff]  }
  0x90   :  { %2965 = vmatprep.subr.bf16.mxu1 %v3213_v21  ;;  %v3257_v21 = vld [vmem:[#allocation5 + $0x4e8] sm:$0xff]  }
  0x91   :  { %2112 = vmatmul.mubr.bf16.gmra.mrb[20].mxu0 %v2538_v19  ;;  %v3255_v19 = vld [vmem:[#allocation5 + $0x4a0] sm:$0xff]  }
  0x92   :  { %2938 = vmatpush3.bf16.msra.mxu0 %v3214_v25  ;;  %2161 = vmatmul.mubr.bf16.gmra.mrb[20].mxu1 %v2540_v26  ;;  %v3261_v25 = vld [vmem:[#allocation5 + $0x4f0] sm:$0xff]  }
  0x93   :  { %2966 = vmatpush3.bf16.msra.mxu1 %v3215_v27  ;;  %2939 = vmatprep.subr.bf16.mxu0 %v3216_v28  ;;  %v3262_v26 = vld [vmem:[#allocation5 + $0x430] sm:$0xff]   ;;  %v3264_v28 = vld [vmem:[#allocation5 + $0x478] sm:$0xff]  }
  0x94   :  { %2967 = vmatprep.subr.bf16.mxu1 %v3217_v29  ;;  %2201 = vmatprep.mubr.bf16.mxu0 %v2519_v52  ;;  %v3263_v27 = vld [vmem:[#allocation5 + $0x4b0] sm:$0xff]   ;;  %v3265_v29 = vld [vmem:[#allocation5 + $0x4f8] sm:$0xff]  }
  0x95   :  { %2250 = vmatprep.mubr.bf16.mxu1 %v2521_v55  ;;  %v3276_v52 = vld [vmem:[#allocation5 + $0x550] sm:$0xff]   ;;  %v89_v55 = vld [vmem:[#allocation2 + $0x168] sm:$0xff] }
  0x96   :  { %2940 = vmatpush3.bf16.msra.mxu0 %v3218_v30  ;;  %v3266_v30 = vld [vmem:[#allocation5 + $0x438] sm:$0xff]  }
  0x97   :  { %2968 = vmatpush3.bf16.msra.mxu1 %v3219_v31  ;;  %2941 = vmatprep.subr.bf16.mxu0 %v3220_v32  ;;  %v3267_v31 = vld [vmem:[#allocation5 + $0x4b8] sm:$0xff]   ;;  %v52_v32 = vld [vmem:[#allocation2 + $0x40] sm:$0xff] }
  0x98   :  { %2969 = vmatprep.subr.bf16.mxu1 %v3221_v33  ;;  %v64_v33 = vld [vmem:[#allocation2 + $0xa0] sm:$0xff] }
  0x9a   :  { %2942 = vmatpush3.bf16.msra.mxu0 %v3222_v34  ;;  %v53_v34 = vld [vmem:[#allocation2 + $0x48] sm:$0xff] }
  0x9b   :  { %2970 = vmatpush3.bf16.msra.mxu1 %v3223_v35  ;;  %2943 = vmatprep.subr.bf16.mxu0 %v3224_v36  ;;  %v65_v35 = vld [vmem:[#allocation2 + $0xa8] sm:$0xff]  ;;  %v2522_v36 = vcombine.low %v52_v32, %v64_v33 }
  0x9c   :  { %2971 = vmatprep.subr.bf16.mxu1 %v3225_v37  ;;  %v2523_v37 = vcombine.high %v52_v32, %v64_v33 }
  0x9e   :  { %2944 = vmatpush3.bf16.msra.mxu0 %v3226_v38  ;;  %v2524_v38 = vcombine.low %v53_v34, %v65_v35 }
  0x9f   :  { %2972 = vmatpush3.bf16.msra.mxu1 %v3227_v39  ;;  %2945 = vmatprep.subr.bf16.mxu0 %v3228_v40  ;;  %v2525_v39 = vcombine.high %v53_v34, %v65_v35  ;;  %v3268_v40 = vld [vmem:[#allocation5 + $0x540] sm:$0xff]  }
  0xa0   :  { %2973 = vmatprep.subr.bf16.mxu1 %v3229_v41  ;;  %v3269_v41 = vld [vmem:[#allocation5 + $0x5c0] sm:$0xff]  }
  0xa1   :  { %v2505_v34 = vld [vmem:[%s3446_s2] ss:$0 sm:$0xff]  ;;  %s3378_s2 = smov [#allocation7]  }
  0xa2   :  { %2946 = vmatpush3.bf16.msra.mxu0 %v3230_v42  ;;  %v3270_v42 = vld [vmem:[#allocation5 + $0x500] sm:$0xff]   ;;  %s2492_s13 = sshll.u32 %s3378_s2, 4  ;;  %s2493_s13 = int_to_ptr.vmem [resolvable:$true] %s2492_s13 }
  0xa3   :  { %2974 = vmatpush3.bf16.msra.mxu1 %v3231_v43  ;;  %2947 = vmatprep.subr.bf16.mxu0 %v3232_v44  ;;  %v3271_v43 = vld [vmem:[#allocation5 + $0x580] sm:$0xff]   ;;  %v3272_v44 = vld [vmem:[#allocation5 + $0x548] sm:$0xff]   ;;  %s3344_s14 = scalar_lea.vmem %s2493_s13, 256  ;;  %p3349_p3 = scmp.lt.s32.totalorder %s2493_s13, %s2493_s13 }
  0xa4   :  { %2975 = vmatprep.subr.bf16.mxu1 %v3233_v45  ;;  %v3273_v45 = vld [vmem:[#allocation5 + $0x5c8] sm:$0xff]   ;;  %p3345_p2 = scmp.ne.s32.totalorder %s2493_s13, %s3344_s14  ;;  %p3350_p4 = scmp.lt.s32.totalorder %s3344_s14, %s3344_s14 }
  0xa6   :  { %2948 = vmatpush3.bf16.msra.mxu0 %v3234_v46  ;;  %v3274_v46 = vld [vmem:[#allocation5 + $0x508] sm:$0xff]   ;;  %p3351_p5 = por %p3350_p4, %p3349_p3 }
  0xa7   :  { %2976 = vmatpush3.bf16.msra.mxu1 %v3235_v47  ;;  %2989 = vmatprep.subr.bf16.mxu0 %v3236_v56  ;;  %v3275_v47 = vld [vmem:[#allocation5 + $0x588] sm:$0xff]  }
  0xa8   :  { %3017 = vmatprep.subr.bf16.mxu1 %v3237_v57  ;;  %v3278_v57 = vld [vmem:[#allocation5 + $0x510] sm:$0xff]   ;;  %p3352_p6 = pnand %p3351_p5, %p3345_p2 }
  0xa9   :  { %2202 = vmatmul.mubr.bf16.vlgmr.msra.gmra.mrb[24].mxu0 %v2518_v51  ;;  %v2546_v51 = vcombine.low %v76_v48, %v88_v49 }
  0xaa   :  { %2251 = vmatmul.mubr.bf16.vlgmr.msra.gmra.mrb[24].mxu1 %v2520_v54  ;;  %2990 = vmatpush3.bf16.msra.mxu0 %v3238_v58  ;;  %v77_v54 = vld [vmem:[#allocation2 + $0x108] sm:$0xff] }
  0xab   :  { %3018 = vmatpush3.bf16.msra.mxu1 %v3239_v59  ;;  %2991 = vmatprep.subr.bf16.mxu0 %v3240_v60  ;;  %v2549_v56 = vcombine.high %v77_v54, %v89_v55  ;;  %v2548_v58 = vcombine.low %v77_v54, %v89_v55  ;;  %v3279_v59 = vld [vmem:[#allocation5 + $0x590] sm:$0xff]   ;;  %v3280_v60 = vld [vmem:[#allocation5 + $0x558] sm:$0xff]  }
  0xac   :  { %3019 = vmatprep.subr.bf16.mxu1 %v3241_v61  ;;  %2209 = vmatprep.mubr.bf16.mxu0 %v2543_v2  ;;  %v3281_v61 = vld [vmem:[#allocation5 + $0x5d8] sm:$0xff]   ;;  %v3286_v2 = vld [vmem:[#allocation5 + $0x520] sm:$0xff]  }
  0xad   :  { %2258 = vmatprep.mubr.bf16.mxu1 %v2545_v8  ;;  %v3292_v8 = vld [vmem:[#allocation5 + $0x570] sm:$0xff]  }
  0xae   :  { %2992 = vmatpush3.bf16.msra.mxu0 %v3242_v62  ;;  %v3282_v62 = vld [vmem:[#allocation5 + $0x518] sm:$0xff]  }
  0xaf   :  { %3020 = vmatpush3.bf16.msra.mxu1 %v3243_v63  ;;  %2993 = vmatprep.subr.bf16.mxu0 %v3244_v4  ;;  %v3283_v63 = vld [vmem:[#allocation5 + $0x598] sm:$0xff]   ;;  %v3288_v4 = vld [vmem:[#allocation5 + $0x568] sm:$0xff]  }
  0xb0   :  { %3021 = vmatprep.subr.bf16.mxu1 %v3245_v5  ;;  %v3289_v5 = vld [vmem:[#allocation5 + $0x5e8] sm:$0xff]  }
  0xb1   :  { %2210 = vmatmul.mubr.bf16.gmra.mrb[28].mxu0 %v2542_v3  ;;  %v3287_v3 = vld [vmem:[#allocation5 + $0x5a0] sm:$0xff]  }
  0xb2   :  { %2994 = vmatpush3.bf16.msra.mxu0 %v3246_v9  ;;  %2259 = vmatmul.mubr.bf16.gmra.mrb[28].mxu1 %v2544_v10  ;;  %v3293_v9 = vld [vmem:[#allocation5 + $0x5f0] sm:$0xff]  }
  0xb3   :  { %3022 = vmatpush3.bf16.msra.mxu1 %v3247_v11  ;;  %2995 = vmatprep.subr.bf16.mxu0 %v3248_v12  ;;  %v3294_v10 = vld [vmem:[#allocation5 + $0x530] sm:$0xff]   ;;  %v3296_v12 = vld [vmem:[#allocation5 + $0x578] sm:$0xff]  }
  0xb4   :  { %3023 = vmatprep.subr.bf16.mxu1 %v3249_v13  ;;  %2299 = vmatprep.mubr.bf16.mxu0 %v2523_v37  ;;  %v3295_v11 = vld [vmem:[#allocation5 + $0x5b0] sm:$0xff]   ;;  %v3297_v13 = vld [vmem:[#allocation5 + $0x5f8] sm:$0xff]  }
  0xb5   :  { %2348 = vmatprep.mubr.bf16.mxu1 %v2525_v39 }
  0xb6   :  { %2996 = vmatpush3.bf16.msra.mxu0 %v3250_v14  ;;  %v3298_v14 = vld [vmem:[#allocation5 + $0x538] sm:$0xff]  }
  0xb7   :  { %3024 = vmatpush3.bf16.msra.mxu1 %v3251_v15  ;;  %2997 = vmatprep.subr.bf16.mxu0 %v3252_v16  ;;  %v3299_v15 = vld [vmem:[#allocation5 + $0x5b8] sm:$0xff]   ;;  %v54_v16 = vld [vmem:[#allocation2 + $0x50] sm:$0xff] }
  0xb8   :  { %3025 = vmatprep.subr.bf16.mxu1 %v3253_v17  ;;  %v66_v17 = vld [vmem:[#allocation2 + $0xb0] sm:$0xff] }
  0xba   :  { %2998 = vmatpush3.bf16.msra.mxu0 %v3254_v18  ;;  %v2526_v18 = vcombine.low %v54_v16, %v66_v17 }
  0xbb   :  { %3026 = vmatpush3.bf16.msra.mxu1 %v3255_v19  ;;  %2999 = vmatprep.subr.bf16.mxu0 %v3256_v20  ;;  %v2527_v19 = vcombine.high %v54_v16, %v66_v17  ;;  %v55_v20 = vld [vmem:[#allocation2 + $0x58] sm:$0xff] }
  0xbc   :  { %3027 = vmatprep.subr.bf16.mxu1 %v3257_v21  ;;  %v67_v21 = vld [vmem:[#allocation2 + $0xb8] sm:$0xff] }
  0xbe   :  { %3000 = vmatpush3.bf16.msra.mxu0 %v3258_v22  ;;  %v78_v22 = vld [vmem:[#allocation2 + $0x110] sm:$0xff] }
  0xbf   :  { %3028 = vmatpush3.bf16.msra.mxu1 %v3259_v23  ;;  %3001 = vmatprep.subr.bf16.mxu0 %v3260_v24  ;;  %v2528_v23 = vcombine.low %v55_v20, %v67_v21  ;;  %v2529_v24 = vcombine.high %v55_v20, %v67_v21 }
  0xc0   :  { %3029 = vmatprep.subr.bf16.mxu1 %v3261_v25  ;;  %v90_v25 = vld [vmem:[#allocation2 + $0x170] sm:$0xff] }
  0xc2   :  { %3002 = vmatpush3.bf16.msra.mxu0 %v3262_v26  ;;  %v79_v26 = vld [vmem:[#allocation2 + $0x118] sm:$0xff] }
  0xc3   :  { %3030 = vmatpush3.bf16.msra.mxu1 %v3263_v27  ;;  %3003 = vmatprep.subr.bf16.mxu0 %v3264_v28  ;;  %v91_v27 = vld [vmem:[#allocation2 + $0x178] sm:$0xff]  ;;  %v2551_v28 = vcombine.high %v78_v22, %v90_v25 }
  0xc4   :  { %3031 = vmatprep.subr.bf16.mxu1 %v3265_v29  ;;  %v2553_v29 = vcombine.high %v79_v26, %v91_v27 }
  0xc6   :  { %3004 = vmatpush3.bf16.msra.mxu0 %v3266_v30  ;;  %v2550_v30 = vcombine.low %v78_v22, %v90_v25 }
  0xc7   :  { %3032 = vmatpush3.bf16.msra.mxu1 %v3267_v31  ;;  %3045 = vmatprep.subr.bf16.mxu0 %v3268_v40  ;;  %v2552_v31 = vcombine.low %v79_v26, %v91_v27 }
  0xc8   :  { %3073 = vmatprep.subr.bf16.mxu1 %v3269_v41 }
  0xc9   :  { %2300 = vmatmul.mubr.bf16.vlgmr.msra.gmra.mrb[32].mxu0 %v2522_v36 }
  0xca   :  { %2349 = vmatmul.mubr.bf16.vlgmr.msra.gmra.mrb[32].mxu1 %v2524_v38  ;;  %3046 = vmatpush3.bf16.msra.mxu0 %v3270_v42 }
  0xcb   :  { %3074 = vmatpush3.bf16.msra.mxu1 %v3271_v43  ;;  %3047 = vmatprep.subr.bf16.mxu0 %v3272_v44 }
  0xcc   :  { %3075 = vmatprep.subr.bf16.mxu1 %v3273_v45  ;;  %2307 = vmatprep.mubr.bf16.mxu0 %v2547_v50 }
  0xcd   :  { %2356 = vmatprep.mubr.bf16.mxu1 %v2549_v56 }
  0xce   :  { %3048 = vmatpush3.bf16.msra.mxu0 %v3274_v46 }
  0xcf   :  { %3076 = vmatpush3.bf16.msra.mxu1 %v3275_v47  ;;  %3049 = vmatprep.subr.bf16.mxu0 %v3276_v52 }
  0xd0   :  { %3077 = vmatprep.subr.bf16.mxu1 %v3277_v53 }
  0xd1   :  { %2308 = vmatmul.mubr.bf16.gmra.mrb[36].mxu0 %v2546_v51 }
  0xd2   :  { %3050 = vmatpush3.bf16.msra.mxu0 %v3278_v57  ;;  %2357 = vmatmul.mubr.bf16.gmra.mrb[36].mxu1 %v2548_v58 }
  0xd3   :  { %3078 = vmatpush3.bf16.msra.mxu1 %v3279_v59  ;;  %3051 = vmatprep.subr.bf16.mxu0 %v3280_v60 }
  0xd4   :  { %3079 = vmatprep.subr.bf16.mxu1 %v3281_v61  ;;  %2397 = vmatprep.mubr.bf16.mxu0 %v2527_v19 }
  0xd5   :  { %2446 = vmatprep.mubr.bf16.mxu1 %v2529_v24 }
  0xd6   :  { %3052 = vmatpush3.bf16.msra.mxu0 %v3282_v62 }
  0xd7   :  { %3080 = vmatpush3.bf16.msra.mxu1 %v3283_v63  ;;  %3053 = vmatprep.subr.bf16.mxu0 %v3284_v0 }
  0xd8   :  { %3081 = vmatprep.subr.bf16.mxu1 %v3285_v1 }
  0xda   :  { %3054 = vmatpush3.bf16.msra.mxu0 %v3286_v2 }
  0xdb   :  { %3082 = vmatpush3.bf16.msra.mxu1 %v3287_v3  ;;  %3055 = vmatprep.subr.bf16.mxu0 %v3288_v4 }
  0xdc   :  { %3083 = vmatprep.subr.bf16.mxu1 %v3289_v5 }
  0xde   :  { %3056 = vmatpush3.bf16.msra.mxu0 %v3290_v6 }
  0xdf   :  { %3084 = vmatpush3.bf16.msra.mxu1 %v3291_v7  ;;  %3057 = vmatprep.subr.bf16.mxu0 %v3292_v8 }
  0xe0   :  { %3085 = vmatprep.subr.bf16.mxu1 %v3293_v9 }
  0xe2   :  { %3058 = vmatpush3.bf16.msra.mxu0 %v3294_v10 }
  0xe3   :  { %3086 = vmatpush3.bf16.msra.mxu1 %v3295_v11  ;;  %3059 = vmatprep.subr.bf16.mxu0 %v3296_v12 }
  0xe4   :  { %3087 = vmatprep.subr.bf16.mxu1 %v3297_v13 }
  0xe6   :  { %3060 = vmatpush3.bf16.msra.mxu0 %v3298_v14 }
  0xe7   :  { %3088 = vmatpush3.bf16.msra.mxu1 %v3299_v15 }
  0xe9   :  { %2398 = vmatmul.mubr.bf16.vlgmr.msra.gmra.mrb[40].mxu0 %v2526_v18 }
  0xea   :  { %2447 = vmatmul.mubr.bf16.vlgmr.msra.gmra.mrb[40].mxu1 %v2528_v23  ;;  %2405 = vmatprep.mubr.bf16.mxu0 %v2551_v28 }
  0xeb   :  { %2454 = vmatprep.mubr.bf16.mxu1 %v2553_v29 }
  0xf1   :  { %2406 = vmatmul.mubr.bf16.gmra.mrb[44].mxu0 %v2550_v30 }
  0xf2   :  { %2455 = vmatmul.mubr.bf16.gmra.mrb[44].mxu1 %v2552_v31 }
 0x11c   :  { %v2781_v32 = vpop.f32.mrb[0].mxu0 }
 0x11d   :  { %v2809_v33 = vpop.f32.mrb[0].mxu1  ;;  %v2782_v35 = vpop.f32.mrb[1].mxu0 }
 0x11e   :  { %v2783_v36 = vadd.f32 %v2782_v35, %v2781_v32  ;;  %v2810_v37 = vpop.f32.mrb[1].mxu1  ;;  %v2784_v38 = vpop.f32.mrb[2].mxu0 }
 0x11f   :  { %v2811_v39 = vadd.f32 %v2810_v37, %v2809_v33  ;;  %v2812_v40 = vpop.f32.mrb[2].mxu1  ;;  %v2785_v41 = vpop.f32.mrb[3].mxu0 }
 0x120   :  { %v1910_v42 = vadd.f32 %v2783_v36, %v2505_v34  ;;  %v2786_v43 = vadd.f32 %v2785_v41, %v2784_v38  ;;  %v2813_v44 = vpop.f32.mrb[3].mxu1 }
 0x121   :  { %v2814_v45 = vadd.f32 %v2813_v44, %v2812_v40 }
 0x122   :  { %v1959_v46 = vadd.f32 %v2811_v39, %v1910_v42  ;;  %v1913_v47 = vadd.f32 %v2786_v43, %v2505_v34 }
 0x124   :  { %v1962_v48 = vadd.f32 %v2814_v45, %v1913_v47  ;;  %v2787_v49 = vpop.f32.mrb[4].mxu0 }
 0x125   :  { %v2788_v50 = vpop.f32.mrb[5].mxu0  ;;  %v2815_v53 = vpop.f32.mrb[4].mxu1 }
 0x126   :  { %v2789_v51 = vadd.f32 %v2788_v50, %v2787_v49  ;;  %v2790_v52 = vpop.f32.mrb[6].mxu0  ;;  %v2816_v57 = vpop.f32.mrb[5].mxu1 }
 0x127   :  { %v2791_v54 = vpop.f32.mrb[7].mxu0  ;;  %v2817_v58 = vadd.f32 %v2816_v57, %v2815_v53  ;;  %v2818_v59 = vpop.f32.mrb[6].mxu1 }
 0x128   :  { %v1918_v55 = vadd.f32 %v2789_v51, %v2505_v34  ;;  %v2792_v56 = vadd.f32 %v2791_v54, %v2790_v52  ;;  %v2819_v61 = vpop.f32.mrb[7].mxu1 }
 0x129   :  { %v2820_v63 = vadd.f32 %v2819_v61, %v2818_v59 }
 0x12a   :  { %v1921_v60 = vadd.f32 %v2792_v56, %v2505_v34  ;;  %v1967_v62 = vadd.f32 %v2817_v58, %v1918_v55 }
 0x12c   :  { %v1970_v0 = vadd.f32 %v2820_v63, %v1921_v60 }
 0x13c   :  { %v2837_v1 = vpop.f32.mrb[8].mxu0 }
 0x13d   :  { %v2865_v2 = vpop.f32.mrb[8].mxu1  ;;  %v2838_v3 = vpop.f32.mrb[9].mxu0 }
 0x13e   :  { %v2866_v4 = vpop.f32.mrb[9].mxu1  ;;  %v2839_v5 = vadd.f32 %v2838_v3, %v2837_v1  ;;  %v2840_v7 = vpop.f32.mrb[10].mxu0 }
 0x13f   :  { %v2867_v6 = vadd.f32 %v2866_v4, %v2865_v2  ;;  %v2868_v8 = vpop.f32.mrb[10].mxu1  ;;  %v2841_v9 = vpop.f32.mrb[11].mxu0 }
 0x140   :  { %v2869_v10 = vpop.f32.mrb[11].mxu1  ;;  %v2008_v11 = vadd.f32 %v2839_v5, %v1959_v46  ;;  %v2842_v12 = vadd.f32 %v2841_v9, %v2840_v7 }
 0x141   :  { %v2870_v13 = vadd.f32 %v2869_v10, %v2868_v8 }
 0x142   :  { %v2057_v14 = vadd.f32 %v2867_v6, %v2008_v11  ;;  %v2011_v15 = vadd.f32 %v2842_v12, %v1962_v48 }
 0x144   :  { %v2060_v16 = vadd.f32 %v2870_v13, %v2011_v15  ;;  %v2843_v17 = vpop.f32.mrb[12].mxu0 }
 0x145   :  { %v2844_v18 = vpop.f32.mrb[13].mxu0  ;;  %v2871_v23 = vpop.f32.mrb[12].mxu1 }
 0x146   :  { %v2845_v19 = vadd.f32 %v2844_v18, %v2843_v17  ;;  %v2846_v20 = vpop.f32.mrb[14].mxu0  ;;  %v2872_v25 = vpop.f32.mrb[13].mxu1 }
 0x147   :  { %v2847_v21 = vpop.f32.mrb[15].mxu0  ;;  %v2873_v27 = vadd.f32 %v2872_v25, %v2871_v23  ;;  %v2874_v28 = vpop.f32.mrb[14].mxu1 }
 0x148   :  { %v2016_v22 = vadd.f32 %v2845_v19, %v1967_v62  ;;  %v2848_v24 = vadd.f32 %v2847_v21, %v2846_v20  ;;  %v2875_v29 = vpop.f32.mrb[15].mxu1 }
 0x149   :  { %v2876_v31 = vadd.f32 %v2875_v29, %v2874_v28 }
 0x14a   :  { %v2019_v26 = vadd.f32 %v2848_v24, %v1970_v0  ;;  %v2065_v30 = vadd.f32 %v2873_v27, %v2016_v22 }
 0x14c   :  { %v2068_v32 = vadd.f32 %v2876_v31, %v2019_v26 }
 0x15c   :  { %v2893_v33 = vpop.f32.mrb[16].mxu0 }
 0x15d   :  { %v2921_v34 = vpop.f32.mrb[16].mxu1  ;;  %v2894_v35 = vpop.f32.mrb[17].mxu0 }
 0x15e   :  { %v2895_v36 = vadd.f32 %v2894_v35, %v2893_v33  ;;  %v2922_v37 = vpop.f32.mrb[17].mxu1  ;;  %v2896_v38 = vpop.f32.mrb[18].mxu0 }
 0x15f   :  { %v2923_v39 = vadd.f32 %v2922_v37, %v2921_v34  ;;  %v2924_v40 = vpop.f32.mrb[18].mxu1  ;;  %v2897_v41 = vpop.f32.mrb[19].mxu0 }
 0x160   :  { %v2106_v42 = vadd.f32 %v2895_v36, %v2057_v14  ;;  %v2898_v43 = vadd.f32 %v2897_v41, %v2896_v38  ;;  %v2925_v44 = vpop.f32.mrb[19].mxu1 }
 0x161   :  { %v2926_v45 = vadd.f32 %v2925_v44, %v2924_v40 }
 0x162   :  { %v2155_v46 = vadd.f32 %v2923_v39, %v2106_v42  ;;  %v2109_v47 = vadd.f32 %v2898_v43, %v2060_v16 }
 0x164   :  { %v2158_v48 = vadd.f32 %v2926_v45, %v2109_v47  ;;  %v2899_v49 = vpop.f32.mrb[20].mxu0 }
 0x165   :  { %v2900_v50 = vpop.f32.mrb[21].mxu0  ;;  %v2927_v53 = vpop.f32.mrb[20].mxu1 }
 0x166   :  { %v2901_v51 = vadd.f32 %v2900_v50, %v2899_v49  ;;  %v2902_v52 = vpop.f32.mrb[22].mxu0  ;;  %v2928_v57 = vpop.f32.mrb[21].mxu1 }
 0x167   :  { %v2903_v54 = vpop.f32.mrb[23].mxu0  ;;  %v2929_v58 = vadd.f32 %v2928_v57, %v2927_v53  ;;  %v2930_v59 = vpop.f32.mrb[22].mxu1 }
 0x168   :  { %v2114_v55 = vadd.f32 %v2901_v51, %v2065_v30  ;;  %v2904_v56 = vadd.f32 %v2903_v54, %v2902_v52  ;;  %v2931_v61 = vpop.f32.mrb[23].mxu1 }
 0x169   :  { %v2932_v63 = vadd.f32 %v2931_v61, %v2930_v59 }
 0x16a   :  { %v2117_v60 = vadd.f32 %v2904_v56, %v2068_v32  ;;  %v2163_v62 = vadd.f32 %v2929_v58, %v2114_v55 }
 0x16c   :  { %v2166_v0 = vadd.f32 %v2932_v63, %v2117_v60 }
 0x17c   :  { %v2949_v1 = vpop.f32.mrb[24].mxu0 }
 0x17d   :  { %v2977_v2 = vpop.f32.mrb[24].mxu1  ;;  %v2950_v3 = vpop.f32.mrb[25].mxu0 }
 0x17e   :  { %v2951_v4 = vadd.f32 %v2950_v3, %v2949_v1  ;;  %v2978_v5 = vpop.f32.mrb[25].mxu1  ;;  %v2952_v6 = vpop.f32.mrb[26].mxu0 }
 0x17f   :  { %v2979_v7 = vadd.f32 %v2978_v5, %v2977_v2  ;;  %v2980_v8 = vpop.f32.mrb[26].mxu1  ;;  %v2953_v9 = vpop.f32.mrb[27].mxu0 }
 0x180   :  { %v2204_v10 = vadd.f32 %v2951_v4, %v2155_v46  ;;  %v2954_v11 = vadd.f32 %v2953_v9, %v2952_v6  ;;  %v2981_v12 = vpop.f32.mrb[27].mxu1 }
 0x181   :  { %v2982_v13 = vadd.f32 %v2981_v12, %v2980_v8 }
 0x182   :  { %v2253_v14 = vadd.f32 %v2979_v7, %v2204_v10  ;;  %v2207_v15 = vadd.f32 %v2954_v11, %v2158_v48 }
 0x184   :  { %v2256_v16 = vadd.f32 %v2982_v13, %v2207_v15  ;;  %v2955_v17 = vpop.f32.mrb[28].mxu0 }
 0x185   :  { %v2956_v18 = vpop.f32.mrb[29].mxu0  ;;  %v2983_v23 = vpop.f32.mrb[28].mxu1 }
 0x186   :  { %v2957_v19 = vadd.f32 %v2956_v18, %v2955_v17  ;;  %v2958_v20 = vpop.f32.mrb[30].mxu0  ;;  %v2984_v25 = vpop.f32.mrb[29].mxu1 }
 0x187   :  { %v2959_v21 = vpop.f32.mrb[31].mxu0  ;;  %v2985_v27 = vadd.f32 %v2984_v25, %v2983_v23  ;;  %v2986_v28 = vpop.f32.mrb[30].mxu1 }
 0x188   :  { %v2212_v22 = vadd.f32 %v2957_v19, %v2163_v62  ;;  %v2960_v24 = vadd.f32 %v2959_v21, %v2958_v20  ;;  %v2987_v29 = vpop.f32.mrb[31].mxu1 }
 0x189   :  { %v2988_v31 = vadd.f32 %v2987_v29, %v2986_v28 }
 0x18a   :  { %v2215_v26 = vadd.f32 %v2960_v24, %v2166_v0  ;;  %v2261_v30 = vadd.f32 %v2985_v27, %v2212_v22 }
 0x18c   :  { %v2264_v32 = vadd.f32 %v2988_v31, %v2215_v26 }
 0x19c   :  { %v3005_v33 = vpop.f32.mrb[32].mxu0 }
 0x19d   :  { %v3033_v34 = vpop.f32.mrb[32].mxu1  ;;  %v3006_v35 = vpop.f32.mrb[33].mxu0 }
 0x19e   :  { %v3034_v36 = vpop.f32.mrb[33].mxu1  ;;  %v3007_v37 = vadd.f32 %v3006_v35, %v3005_v33  ;;  %v3008_v39 = vpop.f32.mrb[34].mxu0 }
 0x19f   :  { %v3035_v38 = vadd.f32 %v3034_v36, %v3033_v34  ;;  %v3036_v40 = vpop.f32.mrb[34].mxu1  ;;  %v3009_v41 = vpop.f32.mrb[35].mxu0 }
 0x1a0   :  { %v3037_v42 = vpop.f32.mrb[35].mxu1  ;;  %v2302_v43 = vadd.f32 %v3007_v37, %v2253_v14  ;;  %v3010_v44 = vadd.f32 %v3009_v41, %v3008_v39 }
 0x1a1   :  { %v3038_v45 = vadd.f32 %v3037_v42, %v3036_v40 }
 0x1a2   :  { %v2351_v46 = vadd.f32 %v3035_v38, %v2302_v43  ;;  %v2305_v47 = vadd.f32 %v3010_v44, %v2256_v16 }
 0x1a4   :  { %v2354_v48 = vadd.f32 %v3038_v45, %v2305_v47  ;;  %v3011_v49 = vpop.f32.mrb[36].mxu0 }
 0x1a5   :  { %v3012_v50 = vpop.f32.mrb[37].mxu0  ;;  %v3039_v55 = vpop.f32.mrb[36].mxu1 }
 0x1a6   :  { %v3013_v51 = vadd.f32 %v3012_v50, %v3011_v49  ;;  %v3014_v52 = vpop.f32.mrb[38].mxu0  ;;  %v3040_v57 = vpop.f32.mrb[37].mxu1 }
 0x1a7   :  { %v3015_v53 = vpop.f32.mrb[39].mxu0  ;;  %v3041_v59 = vadd.f32 %v3040_v57, %v3039_v55  ;;  %v3042_v60 = vpop.f32.mrb[38].mxu1 }
 0x1a8   :  { %v2310_v54 = vadd.f32 %v3013_v51, %v2261_v30  ;;  %v3016_v56 = vadd.f32 %v3015_v53, %v3014_v52  ;;  %v3043_v61 = vpop.f32.mrb[39].mxu1 }
 0x1a9   :  { %v3044_v63 = vadd.f32 %v3043_v61, %v3042_v60 }
 0x1aa   :  { %v2313_v58 = vadd.f32 %v3016_v56, %v2264_v32  ;;  %v2359_v62 = vadd.f32 %v3041_v59, %v2310_v54 }
 0x1ac   :  { %v2362_v0 = vadd.f32 %v3044_v63, %v2313_v58 }
 0x1bc   :  { %v3061_v1 = vpop.f32.mrb[40].mxu0 }
 0x1bd   :  { %v3089_v2 = vpop.f32.mrb[40].mxu1  ;;  %v3062_v3 = vpop.f32.mrb[41].mxu0 }
 0x1be   :  { %v3063_v4 = vadd.f32 %v3062_v3, %v3061_v1  ;;  %v3090_v5 = vpop.f32.mrb[41].mxu1  ;;  %v3064_v6 = vpop.f32.mrb[42].mxu0 }
 0x1bf   :  { %v3091_v7 = vadd.f32 %v3090_v5, %v3089_v2  ;;  %v3092_v8 = vpop.f32.mrb[42].mxu1  ;;  %v3065_v9 = vpop.f32.mrb[43].mxu0 }
 0x1c0   :  { %v2400_v10 = vadd.f32 %v3063_v4, %v2351_v46  ;;  %v3066_v11 = vadd.f32 %v3065_v9, %v3064_v6  ;;  %v3093_v12 = vpop.f32.mrb[43].mxu1 }
 0x1c1   :  { %v3094_v13 = vadd.f32 %v3093_v12, %v3092_v8 }
 0x1c2   :  { %v2449_v14 = vadd.f32 %v3091_v7, %v2400_v10  ;;  %v2403_v15 = vadd.f32 %v3066_v11, %v2354_v48 }
 0x1c4   :  { %v2452_v16 = vadd.f32 %v3094_v13, %v2403_v15  ;;  %v3067_v17 = vpop.f32.mrb[44].mxu0  ;;  %v2463_v20 = vmax.f32 %v2449_v14, 0.0 }
 0x1c5   :  { %v3095_v18 = vpop.f32.mrb[44].mxu1  ;;  %v3068_v19 = vpop.f32.mrb[45].mxu0 }
 0x1c6   :  { %v2464_v21 = vmax.f32 %v2452_v16, 0.0  ;;  %v3069_v22 = vadd.f32 %v3068_v19, %v3067_v17  ;;  %v3096_v23 = vpop.f32.mrb[45].mxu1  ;;  %v3070_v24 = vpop.f32.mrb[46].mxu0 }
 0x1c7   :  { %v3097_v25 = vadd.f32 %v3096_v23, %v3095_v18  ;;  %v3098_v26 = vpop.f32.mrb[46].mxu1  ;;  %v3071_v27 = vpop.f32.mrb[47].mxu0 }
 0x1c8   :  { %v2757_v28 = vpack.c.bf16 %v2464_v21, %v2463_v20  ;;  %v2408_v29 = vadd.f32 %v3069_v22, %v2359_v62  ;;  %v3072_v30 = vadd.f32 %v3071_v27, %v3070_v24  ;;  %v3099_v31 = vpop.f32.mrb[47].mxu1 }
 0x1c9   :  { %v3100_v32 = vadd.f32 %v3099_v31, %v3098_v26 }
 0x1ca   :  { %2758 = vst [vmem:[#allocation7] sm:$0xff] %v2757_v28   ;;  %v2457_v33 = vadd.f32 %v3097_v25, %v2408_v29  ;;  %v2411_v34 = vadd.f32 %v3072_v30, %v2362_v0 }
 0x1cc   :  { %v2460_v35 = vadd.f32 %v3100_v32, %v2411_v34  ;;  %v2465_v36 = vmax.f32 %v2457_v33, 0.0 }
 0x1ce   :  { %v2466_v37 = vmax.f32 %v2460_v35, 0.0 }
 0x1d0   :  { %v2762_v38 = vpack.c.bf16 %v2466_v37, %v2465_v36 }
 0x1d2   :  { %2764 = vst [vmem:[#allocation7 + $0x8] sm:$0xff] %v2762_v38  }
 0x1d3   :  { %3355 = shalt.err (!%p3352_p6)
}
 0x1d4   :  { %s3356_s17 = scalar_lea.hbm %s3447_s3, 256 }
 0x1d5   :  { %p3357_p7 = scmp.ne.s32.totalorder %s3447_s3, %s3356_s17  ;;  %p3360_p8 = scmp.lt.u32.totalorder %s3356_s17, %s3447_s3 }
 0x1d7   :  { %p3362_p9 = pnand %p3360_p8, %p3357_p7 }
 0x1d9   :  { %3365 = shalt.err (!%p3362_p9)
}
 0x1da   :  { %2498 = dma.vmem_to_hbm [thread:$0]  %s2493_s13, 256, %s3447_s3, [#allocation4], %s3376_s0, %s3376_s0, %s3377_s9  }
 0x1db   :  { %3370 = dma.done.wait [#allocation4], 256  }
 0x1dc   :  { %3371 = vsyncadd [#allocation4], 4294967040 }
 0x1dd   :  { %2502 = vsyncpa [#allocation3], 1 }
 0x1de   :  { %2503 = vsyncpa [#allocation6], 1 }
 0x1df   :  { %2504 = vsyncpa [#allocation4], 1 }

</bundles_post_ra>
